<compile_context>
chip_gen: v7x
topology: tpu7x:2x2x1
jax: 0.10.0
libtpu: 0.0.40
codegen_flags: <defaults>
</compile_context>

<pallas_src>
from functools import partial

import jax
import jax.numpy as jnp
from jax.experimental import pallas as pl
from jax.experimental.pallas import tpu as pltpu


def _se_kernel(x_ref, w1t_ref, w2t_ref, o_ref, *, inv_hw):
    """One grid step == TB batch samples.

    x_ref   : VMEM (TB, C, HWp)   input chunk (HWp = padded H*W, lane-dense).
    w1t_ref : VMEM (C, hidden)    first Linear weight, pre-transposed, f32.
    w2t_ref : VMEM (hidden, C)    second Linear weight, pre-transposed, f32.
    o_ref   : VMEM (TB, C, HWp)   output chunk.
    """
    x = x_ref[...]                                              # (TB, C, HWp), input dtype

    # Squeeze: global average pool over spatial (lane-axis reduce, f32 acc).
    # Divide by the TRUE H*W (padding lanes are zero and don't bias the sum).
    pooled = jnp.sum(x, axis=-1, dtype=jnp.float32) * inv_hw    # (TB, C)

    # Excitation: Linear -> ReLU -> Linear -> Sigmoid, batched over TB, f32.
    h = jnp.dot(pooled, w1t_ref[...],
                preferred_element_type=jnp.float32)             # (TB, hidden)
    h = jnp.maximum(h, 0.0)
    g = jnp.dot(h, w2t_ref[...],
                preferred_element_type=jnp.float32)             # (TB, C)
    gate = jax.nn.sigmoid(g)                                    # (TB, C)

    # Scale: broadcast per-channel gate over the lane (spatial) axis.
    # Multiply in the input dtype (no full-size f32 copy of x).
    o_ref[...] = x * gate[:, :, None].astype(o_ref.dtype)


def squeeze_excitation(x: jax.Array, w1: jax.Array, w2: jax.Array) -> jax.Array:
    """Pallas TPU implementation of SqueezeExcitation.forward.

    x  : (B, C, H, W)
    w1 : (hidden, C)  -- weight of nn.Linear(dim, hidden, bias=False)
    w2 : (C, hidden)  -- weight of nn.Linear(hidden, dim, bias=False)
    """
    B, C, H, W = x.shape
    HW = H * W
    hidden = w1.shape[0]
    assert w1.shape == (hidden, C) and w2.shape == (C, hidden)

    itemsize = jnp.dtype(x.dtype).itemsize

    # Lane-dense 2D spatial view; pad spatial axis to a multiple of 128 lanes.
    HWp = ((HW + 127) // 128) * 128
    x2 = x.reshape(B, C, HW)
    if HWp != HW:
        x2 = jnp.pad(x2, ((0, 0), (0, 0), (0, HWp - HW)))

    # --- Pick TB (samples per grid step) against a conservative VMEM budget.
    # Live bytes per step ~= 2 (double buffer) * (in + out) * TB*C*HWp*itemsize
    # + small f32 gate temps.  8 MiB fits comfortably inside the default
    # scoped VMEM limit on v5e/v6e/v7x.
    budget_bytes = 8 * 1024 * 1024
    bytes_per_sample = C * HWp * itemsize
    tb = max(1, budget_bytes // (4 * bytes_per_sample))
    if B >= 2:
        # Keep the grid length >= 2 so v7x's two TensorCores both get work.
        tb = min(tb, max(1, B // 2))
    tb = max(1, min(tb, B))

    # Pad batch so it divides evenly into TB-sized chunks (padded samples are
    # zero; their gated output is zero and gets sliced away).
    n_blocks = pl.cdiv(B, tb)
    B_pad = n_blocks * tb
    if B_pad != B:
        x2 = jnp.pad(x2, ((0, B_pad - B), (0, 0), (0, 0)))

    # Pre-transpose + pre-cast the tiny weights once (resident in VMEM).
    w1t = jnp.transpose(w1).astype(jnp.float32)   # (C, hidden)
    w2t = jnp.transpose(w2).astype(jnp.float32)   # (hidden, C)

    kernel = partial(_se_kernel, inv_hw=1.0 / float(HW))

    cost = pl.CostEstimate(
        flops=2 * B * C * HW + 4 * B * C * hidden,
        transcendentals=B * C,
        bytes_accessed=2 * B * C * HW * itemsize + (2 * C * hidden) * 4,
    )

    out = pl.pallas_call(
        kernel,
        out_shape=jax.ShapeDtypeStruct((B_pad, C, HWp), x.dtype),
        grid_spec=pltpu.PrefetchScalarGridSpec(
            num_scalar_prefetch=0,
            grid=(n_blocks,),
            in_specs=[
                # TB samples per step, lane-dense spatial axis.
                pl.BlockSpec((tb, C, HWp), lambda b: (b, 0, 0)),
                # Tiny weights: full blocks, resident across all grid steps.
                pl.BlockSpec((C, hidden), lambda b: (0, 0)),
                pl.BlockSpec((hidden, C), lambda b: (0, 0)),
            ],
            out_specs=pl.BlockSpec((tb, C, HWp), lambda b: (b, 0, 0)),
        ),
        compiler_params=pltpu.CompilerParams(
            # Independent sample chunks: allow megacore sharding on v7x.
            dimension_semantics=("parallel",),
            vmem_limit_bytes=32 * 1024 * 1024,
        ),
        cost_estimate=cost,
    )(x2, w1t, w2t)

    # Slice off batch / spatial padding and restore NCHW.
    out = out[:B, :, :HW]
    return out.reshape(B, C, H, W)


def _reference(x, w1, w2):
    """Plain-JAX reference matching the PyTorch module."""
    pooled = jnp.mean(x.astype(jnp.float32), axis=(2, 3))     # (B, C)
    h = jnp.maximum(pooled @ w1.astype(jnp.float32).T, 0.0)   # (B, hidden)
    g = jax.nn.sigmoid(h @ w2.astype(jnp.float32).T)          # (B, C)
    return (x.astype(jnp.float32) * g[:, :, None, None]).astype(x.dtype)


if __name__ == "__main__":
    key = jax.random.PRNGKey(0)
    k_x, k_w1, k_w2 = jax.random.split(key, 3)

    # Small shapes consistent with the module: dim=32, shrinkage_rate=0.25.
    B, C, H, W = 2, 32, 16, 16
    hidden = int(C * 0.25)  # 8

    x = jax.random.normal(k_x, (B, C, H, W), dtype=jnp.float32)
    w1 = jax.random.normal(k_w1, (hidden, C), dtype=jnp.float32) * (1.0 / C ** 0.5)
    w2 = jax.random.normal(k_w2, (C, hidden), dtype=jnp.float32) * (1.0 / hidden ** 0.5)

    y = squeeze_excitation(x, w1, w2)
    y = jax.block_until_ready(y)

    y_ref = _reference(x, w1, w2)
    assert y.shape == x.shape
    assert jnp.allclose(y, y_ref, rtol=1e-5, atol=1e-5), (
        f"max abs err = {float(jnp.max(jnp.abs(y - y_ref)))}")

    print("KERNEL_OK")
</pallas_src>

<mosaic_0001>
module attributes {stable_mosaic.version = 11 : i64} {
  func.func @_se_kernel(%arg0: i32, %arg1: memref<1x32x256xf32, #tpu.memory_space<vmem>>, %arg2: memref<32x8xf32, #tpu.memory_space<vmem>>, %arg3: memref<8x32xf32, #tpu.memory_space<vmem>>, %arg4: memref<1x32x256xf32, #tpu.memory_space<vmem>>) attributes {dimension_semantics = [#tpu.dimension_semantics<parallel>], iteration_bounds = array<i64: 2>, scalar_prefetch = 0 : i64, scratch_operands = 0 : i64, tpu.core_type = #tpu.core_type<tc>, window_params = [{transform_indices = @transform_0, window_bounds = array<i64: 1, 32, 256>}, {pipeline_mode = #tpu.pipeline_mode<synchronous>, transform_indices = @transform_1, window_bounds = array<i64: 32, 8>}, {pipeline_mode = #tpu.pipeline_mode<synchronous>, transform_indices = @transform_2, window_bounds = array<i64: 8, 32>}, {transform_indices = @transform_3, window_bounds = array<i64: 1, 32, 256>}]} {
    %c0 = arith.constant 0 : index
    %c0_0 = arith.constant 0 : index
    %c0_1 = arith.constant 0 : index
    %0 = vector.load %arg1[%c0, %c0_0, %c0_1] : memref<1x32x256xf32, #tpu.memory_space<vmem>>, vector<1x32x256xf32>
    %cst = arith.constant dense<0.000000e+00> : vector<1x32xf32>
    %1 = vector.multi_reduction <add>, %0, %cst [2] : vector<1x32x256xf32> to vector<1x32xf32>
    %cst_2 = arith.constant 3.906250e-03 : f32
    %2 = vector.broadcast %cst_2 : f32 to vector<1x32xf32>
    %3 = arith.mulf %1, %2 : vector<1x32xf32>
    %c0_3 = arith.constant 0 : index
    %c0_4 = arith.constant 0 : index
    %4 = vector.load %arg2[%c0_3, %c0_4] : memref<32x8xf32, #tpu.memory_space<vmem>>, vector<32x8xf32>
    %cst_5 = arith.constant dense<0.000000e+00> : vector<1x8xf32>
    %5 = tpu.matmul %3, %4, %cst_5 {dimension_numbers = #tpu.dot_dimension_numbers<[1], [0], [0], [1], [0, 0, 1, 1], [], []>} : vector<1x32xf32>, vector<32x8xf32>, vector<1x8xf32> -> vector<1x8xf32>
    %cst_6 = arith.constant 0.000000e+00 : f32
    %6 = vector.broadcast %cst_6 : f32 to vector<1x8xf32>
    %7 = arith.maximumf %5, %6 : vector<1x8xf32>
    %c0_7 = arith.constant 0 : index
    %c0_8 = arith.constant 0 : index
    %8 = vector.load %arg3[%c0_7, %c0_8] : memref<8x32xf32, #tpu.memory_space<vmem>>, vector<8x32xf32>
    %cst_9 = arith.constant dense<0.000000e+00> : vector<1x32xf32>
    %9 = tpu.matmul %7, %8, %cst_9 {dimension_numbers = #tpu.dot_dimension_numbers<[1], [0], [0], [1], [0, 0, 1, 1], [], []>} : vector<1x8xf32>, vector<8x32xf32>, vector<1x32xf32> -> vector<1x32xf32>
    %10 = arith.negf %9 : vector<1x32xf32>
    %11 = math.exp %10 : vector<1x32xf32>
    %cst_10 = arith.constant 1.000000e+00 : f32
    %12 = vector.broadcast %cst_10 : f32 to vector<1x32xf32>
    %13 = arith.addf %12, %11 : vector<1x32xf32>
    %14 = arith.divf %12, %13 : vector<1x32xf32>
    %15 = vector.shape_cast %14 : vector<1x32xf32> to vector<1x32x1xf32>
    %16 = vector.broadcast %15 : vector<1x32x1xf32> to vector<1x32x256xf32>
    %17 = arith.mulf %0, %16 : vector<1x32x256xf32>
    %c0_11 = arith.constant 0 : index
    %c0_12 = arith.constant 0 : index
    %c0_13 = arith.constant 0 : index
    %18 = vector.load %arg4[%c0_11, %c0_12, %c0_13] : memref<1x32x256xf32, #tpu.memory_space<vmem>>, vector<1x32x256xf32>
    tpu.vector_store %arg4[%c0_11, %c0_12, %c0_13], %17 {strides = array<i32>} : memref<1x32x256xf32, #tpu.memory_space<vmem>>, vector<1x32x256xf32>,
    return
  }
  func.func @transform_0(%arg0: i32) -> (i32, i32, i32) {
    %c0_i32 = arith.constant 0 : i32
    %c0_i32_0 = arith.constant 0 : i32
    %c0_i32_1 = arith.constant 0 : i32
    return %arg0, %c0_i32, %c0_i32_0 : i32, i32, i32
  }
  func.func @transform_1(%arg0: i32) -> (i32, i32) {
    %c0_i32 = arith.constant 0 : i32
    %c0_i32_0 = arith.constant 0 : i32
    %c0_i32_1 = arith.constant 0 : i32
    return %c0_i32, %c0_i32_0 : i32, i32
  }
  func.func @transform_2(%arg0: i32) -> (i32, i32) {
    %c0_i32 = arith.constant 0 : i32
    %c0_i32_0 = arith.constant 0 : i32
    %c0_i32_1 = arith.constant 0 : i32
    return %c0_i32, %c0_i32_0 : i32, i32
  }
  func.func @transform_3(%arg0: i32) -> (i32, i32, i32) {
    %c0_i32 = arith.constant 0 : i32
    %c0_i32_0 = arith.constant 0 : i32
    %c0_i32_1 = arith.constant 0 : i32
    return %arg0, %c0_i32, %c0_i32_0 : i32, i32, i32
  }
}

</mosaic_0001>

<bundles_post_ra>
// kernel: tpu_custom_call.1
= control target key start
LH: loop header
LB: loop body
LE: loop exit
PB: predicated region body
PF: predicated region fallthrough
CT: control target
= control target key end

     0   :  { %8 = vsyncpa [#allocation3], 0  ;;  %s970_s0 = inlined_call_operand.hbm [shape: f32[2,32,256], index: 0, kind: input, shape index: {}]   ;;  %s971_s1 = inlined_call_operand.vmem [shape: f32[32,8], index: 1, kind: input, shape index: {}]   ;;  %s972_s2 = inlined_call_operand.vmem [shape: f32[8,32], index: 2, kind: input, shape index: {}]   ;;  %s973_s3 = inlined_call_operand.hbm [shape: f32[2,32,256], index: 3, kind: output, shape index: {}]  }
   0x1   :  { %10 = vsyncpa [#allocation3 + $0x1], 0 }
   0x2   :  { %11 = vsyncpa [#allocation4], 0 }
   0x3   :  { %13 = vsyncpa [#allocation4 + $0x1], 0  ;;  %s757_s12 = smov 0   ;;  %s759_s13 = smov 0  }
   0x4   :  { %s761_s14 = smov 0   ;;  %s763_s15 = smov 0  }
   0x5 LB: > { %s778_s16 = sadd.s32 4294967295, %s726_s15   ;;  %s525_s17 = sadd.s32 4294967294, %s726_s15   ;;  %s726_s15 = sphi %s763_s15, %s986_s15   ;;  %s722_s14 = sphi %s761_s14, %s985_s14   ;;  %s718_s13 = sphi %s759_s13, %s984_s13   ;;  %s714_s12 = sphi %s757_s12, %s983_s12  }
   0x6   : > { %s782_s18 = sadd.s32 1, %s726_s15   ;;  %s26_s19 = sadd.s32 1, %s722_s14 }
   0x7   : > { %s23_s20 = ssub.s32 %s726_s15, %s782_s18  ;;  %p33_p0 = scmp.ne.s32.totalorder %s722_s14, %s718_s13 }
   0x8   : > { %p24_p1 = scmp.eq.s32.totalorder %s23_s20, 0  ;;  %p34_p2 = scmp.eq.s32.totalorder %s726_s15, 0 }
   0x9   : > { %p39_p3 = scmp.ne.s32.totalorder %s718_s13, %s714_s12  ;;  %p40_p4 = scmp.eq.s32.totalorder %s778_s16, 0 }
   0xa   : > { %s794_s21 = scalar_select %p24_p1, %s722_s14, %s26_s19  }
   0xb   : > { %p796_p5 = por %p34_p2, %p33_p0  ;;  %p800_p6 = por %p40_p4, %p39_p3 }
   0xc   : > { %p105_p7 = scmp.eq.s32.totalorder %s778_s16, 1  ;;  %p111_p8 = scmp.eq.s32.totalorder %s525_s17, 1 }
   0xd   : > { %p585_p10 = scmp.lt.s32.totalorder %s726_s15, 2  ;;  %s137_s26 = sand.u32 1, %s722_s14  }
   0xe   : > { %p807_p11 = por %p105_p7, %p33_p0  ;;  %p811_p12 = por %p111_p8, %p39_p3 }
   0xf   : > { %s542_s27 = sshll.u32 %s726_s15, 10  ;;  %s528_s28 = sshll.u32 %s137_s26, 6 }
  0x10   : > { %s977_s24 = scalar_select %p807_p11, 1, 0 }
  0x11   : > { %s978_s25 = scalar_select %p811_p12, 1, 0 }
  0x12   : > { %s820_s4 = scalar_lea.hbm %s970_s0, %s542_s27  ;;  %s141_s5 = scalar_lea.vmem [#allocation2], %s528_s28 }
  0x13   : > { %s148_s6 = sshll.u32 %s141_s5, 4  ;;  %p824_p13 = pnand %p585_p10, %p796_p5  ;;  %s828_s6 = int_to_ptr.vmem [resolvable:$true] %s148_s6 }
  0x14   : > { %s830_s8 = scalar_lea.sflag [#allocation3], %s137_s26  ;;  %s630_s9 = scalar_lea.hbm %s820_s4, 1024 }
  0x15   : > { %p631_p0 = scmp.ne.s32.totalorder %s820_s4, %s630_s9  ;;  %p632_p1 = pneg %p824_p13 }
  0x16   : > { %s635_s17 = scalar_lea.hbm %s970_s0, 2048  ;;  %p636_p4 = scmp.lt.u32.totalorder %s820_s4, %s970_s0 }
  0x17   : > { %p633_p2 = pnand %p632_p1, %p631_p0  ;;  %p637_p5 = scmp.lt.u32.totalorder %s635_s17, %s630_s9 }
  0x18   : > { %p639_p8 = scmp.lt.u32.totalorder %s630_s9, %s820_s4 }
  0x19   : > { %p634_p3 = pneg %p633_p2  ;;  %p638_p7 = por %p637_p5, %p636_p4 }
  0x1b   : > { %p640_p10 = por %p639_p8, %p638_p7 }
  0x1d   : > { %p641_p9 = pnand %p640_p10, %p634_p3 }
  0x1f   : > { %644 = shalt.err (!%p641_p9)
}
  0x20   : > { %s645_s22 = scalar_lea.vmem %s828_s6, 1024  ;;  %s728_s26 = smov [#allocation2]  }
  0x21   : > { %p646_p0 = scmp.ne.s32.totalorder %s828_s6, %s645_s22  ;;  %s650_s27 = sshll.u32 %s728_s26, 4  ;;  %s651_s27 = int_to_ptr.vmem [resolvable:$false] %s650_s27 }
  0x22   : > { %s652_s28 = scalar_lea.vmem %s651_s27, 2048  ;;  %p653_p11 = scmp.lt.s32.totalorder %s828_s6, %s651_s27 }
  0x23   : > { %p648_p2 = pnand %p646_p0, %p632_p1  ;;  %p654_p4 = scmp.lt.s32.totalorder %s652_s28, %s645_s22 }
  0x25   : > { %p649_p12 = pneg %p648_p2  ;;  %p655_p5 = por %p654_p4, %p653_p11 }
  0x27   : > { %p656_p7 = pnand %p655_p5, %p649_p12 }
  0x29   : > { %659 = shalt.err (!%p656_p7)
}
  0x2a   : > { %s729_s29 = smov 256   ;;  %s730_s30 = smov 16  }
  0x2b   : > { %580 = dma.hbm_to_vmem [thread:$0]  (!%p824_p13), %s820_s4, 1024, %s828_s6, %s830_s8, %s729_s29, %s729_s29, %s730_s30  }
  0x2c   : > { %p531_p9 = scmp.ge.s32.totalorder %s726_s15, 1  ;;  %p156_p1 = scmp.lt.s32.totalorder %s726_s15, 3 }
  0x2e   : > { %p157_p3 = pnand %p531_p9, %p156_p1 }
  0x2f   : > { %s861_s5 = sand.u32 (!%p157_p3), 1, %s718_s13  }
  0x30   : > { %160 = sbr.rel (%p157_p3) target bundleno = 806 (0x326), region = 32  ;;  %s532_s9 = sshll.u32 (!%p157_p3), %s861_s5, 6 }
  0x31   : > { %s163_s10 = scalar_lea.sflag (!%p157_p3), [#allocation3], %s861_s5  ;;  %s166_s11 = scalar_lea.vmem (!%p157_p3), [#allocation2], %s532_s9 }
  0x37   : > { %705 = dma.done.wait (%p800_p6), %s163_s10, 1024  }
  0x38   : > { %707 = vsyncadd (%p800_p6), %s163_s10, 4294966272  ;;  %v871_v0 = vld [vmem:[%s166_s11] sm:$0xff]  ;;  %v873_v1 = vld [vmem:[%s166_s11 + $0x8] sm:$0xff]  ;;  %v731_v15 = vmov 0.0|0.0   ;;  %vm732_vm0 = vmmov 0   ;;  %v733_v19 = vmov 0.0   ;;  %v221_v20 = vlaneseq }
  0x39   : > { %v875_v2 = vld [vmem:[%s166_s11 + $0x20] sm:$0xff]  ;;  %v197_v3 = vadd.f32 %v873_v1, %v871_v0  ;;  %v879_v4 = vld [vmem:[%s166_s11 + $0x28] sm:$0xff]  ;;  %v881_v5 = vld [vmem:[%s166_s11 + $0x10] sm:$0xff]  ;;  %567 = vmatprep.subr.bf16.mxu0 %v731_v15  ;;  %559 = vmatprep.mubr.msk.f32.mxu0 %vm732_vm0, %v733_v19  ;;  %vm232_vm1 = vcmask 130112   ;;  %vm239_vm2 = vcmask 195712   ;;  %vm246_vm3 = vcmask 261312  }
  0x3a   : > { %v883_v6 = vld [vmem:[%s166_s11 + $0x18] sm:$0xff]  ;;  %v203_v7 = vadd.f32 %v879_v4, %v875_v2  ;;  %v887_v8 = vld [vmem:[%s166_s11 + $0x30] sm:$0xff]  ;;  %v213_v12 = vld [vmem:[%s971_s1] sm:$0xff]  ;;  %562 = vmatprep.subr.mxu1 %v733_v19  ;;  %564 = vmatprep.mubr.msk.f32.mxu1 %vm732_vm0, %v733_v19  ;;  %v222_v21 = vand.u32 127, %v221_v20  ;;  %v224_v22 = vshrl.u32 %v221_v20, 7  ;;  %vm248_vm4 = vcmask 261120  }
  0x3b   : > { %v889_v9 = vld [vmem:[%s166_s11 + $0x38] sm:$0xff]  ;;  %198 = vadd.xlane.f32.xlu0 %v197_v3  ;;  %v200_v10 = vadd.f32 %v883_v6, %v881_v5  ;;  %v214_v13 = vld [vmem:[%s971_s1 + $0x8] sm:$0xff]  ;;  %v215_v16 = vld [vmem:[%s971_s1 + $0x10] sm:$0xff]  ;;  %vm323_vm5 = vcmask 64512   ;;  %s188_s27 = scalar_lea.vmem [#allocation5], %s532_s9  ;;  %s543_s29 = sshll.u32 %s778_s16, 10 }
  0x3c   : > { %204 = vadd.xlane.f32.xlu1 %v203_v7  ;;  %v206_v11 = vadd.f32 %v889_v9, %v887_v8  ;;  %v568_v14 = vpack.c.bf16 %v214_v13, %v213_v12  ;;  %v216_v17 = vld [vmem:[%s971_s1 + $0x18] sm:$0xff]  ;;  %v227_v23 = vadd.s32 4294967288, %v222_v21  ;;  %v234_v25 = vadd.s32 4294967280, %v222_v21  ;;  %v322_v45 = vld [vmem:[%s972_s2] sm:$0xff]  ;;  %s452_s28 = sshll.u32 %s188_s27, 4  ;;  %s924_s10 = scalar_lea.hbm %s973_s3, %s543_s29  ;;  %s919_s28 = int_to_ptr.vmem [resolvable:$true] %s452_s28 }
  0x3d   : > { %v571_v18 = vpack.c.bf16 %v216_v17, %v215_v16  ;;  %v241_v26 = vadd.s32 4294967272, %v222_v21  ;;  %v225_v28 = vsub.s32 %v222_v21, %v224_v22  ;;  %563 = vmatpush3.msra.mxu1 %v322_v45  ;;  %v405_v54 = vsub.s32 0, %v224_v22  ;;  %s439_s16 = scalar_lea.sflag [#allocation4], %s861_s5  ;;  %s660_s11 = scalar_lea.vmem %s919_s28, 1024 }
  0x3e   : > { %569 = vmatpush3.bf16.msra.mxu0 %v568_v14  ;;  %v230_v30 = vsub.s32 %v227_v23, %v224_v22  ;;  %v237_v31 = vsub.s32 %v234_v25, %v224_v22  ;;  %p661_p6 = scmp.ne.s32.totalorder %s919_s28, %s660_s11  ;;  %p980_p11 = scmp.ne.s32.totalorder %s977_s24, 0 }
  0x3f   : > { %201 = vadd.xlane.f32.xlu0 %v200_v10  ;;  %570 = vmatprep.subr.bf16.mxu0 %v731_v15  ;;  %v244_v34 = vsub.s32 %v241_v26, %v224_v22  ;;  %s734_s23 = smov [#allocation5]  }
  0x40   : > { %207 = vadd.xlane.f32.xlu1 %v206_v11  ;;  %p662_p12 = pnand %p661_p6, %p980_p11  ;;  %s664_s4 = sshll.u32 %s734_s23, 4  ;;  %s665_s4 = int_to_ptr.vmem [resolvable:$false] %s664_s4 }
  0x41   : > { %s666_s6 = scalar_lea.vmem %s665_s4, 2048  ;;  %p667_p8 = scmp.lt.s32.totalorder %s919_s28, %s665_s4 }
  0x42   : > { %572 = vmatpush3.bf16.msra.mxu0 %v571_v18  ;;  %p663_p13 = pneg %p662_p12  ;;  %p668_p10 = scmp.lt.s32.totalorder %s666_s6, %s660_s11 }
  0x44   : > { %p669_p0 = por %p668_p10, %p667_p8 }
  0x46   : > { %p670_p2 = pnand %p669_p0, %p663_p13 }
  0xc8   : > { %v199_v24 = vpop.xlane.xlu0 %198 }
  0xc9   : > { %v205_v27 = vpop.xlane.xlu1 %204  ;;  %v209_v29 = vmul.f32 0.00390625, %v199_v24 }
  0xca   : > { %v211_v32 = vmul.f32 0.00390625, %v205_v27 }
  0xcb   : > { %v226_v38 = vrot.slane %v209_v29, %v225_v28 }
  0xcc   : > { %v202_v33 = vpop.xlane.xlu0 %201  ;;  %v238_v40 = vrot.slane %v211_v32, %v237_v31 }
  0xcd   : > { %v210_v35 = vmul.f32 0.00390625, %v202_v33  ;;  %v208_v36 = vpop.xlane.xlu1 %207 }
  0xce   : > { %v212_v37 = vmul.f32 0.00390625, %v208_v36 }
  0xcf   : > { %v231_v39 = vrot.slane %v210_v35, %v230_v30 }
  0xd0   : > { %v245_v41 = vrot.slane %v212_v37, %v244_v34 }
  0xd1   : > { %v233_v42 = vsel %vm232_vm1, %v231_v39, %v226_v38 }
  0xd2   : > { %v240_v43 = vsel %vm239_vm2, %v238_v40, %v233_v42 }
  0xd3   : > { %v247_v44 = vsel %vm246_vm3, %v245_v41, %v240_v43 }
  0xd4   : > { %560 = vmatmul.mubr.msk.f32.vlgmr.msra.gmra.mrb[0].mxu0 %vm248_vm4, %v247_v44 }
 0x1a7   : > { %v317_v46 = vpop.f32.mrb[0].mxu0 }
 0x1a8   : > { %v321_v47 = vmax.f32 %v317_v46, 0.0  ;;  %v561_v48 = vpop.f32.mrb[1].mxu0 }
 0x1aa   : > { %565 = vmatmul.mubr.msk.f32.vlgmr.msra.gmra.mrb[0].mxu1 %vm323_vm5, %v321_v47 }
 0x27d   : > { %v393_v49 = vpop.f32.mrb[0].mxu1 }
 0x27e   : > { %v536_v50 = vmul.f32 -1.442695, %v393_v49  ;;  %v566_v51 = vpop.f32.mrb[1].mxu1 }
 0x280   : > { %626 = vpow2.f32 %v536_v50 }
 0x28a   : > { %v627_v52 = vpop.eup %626 }
 0x28b   : > { %v400_v53 = vadd.f32 1.0, %v627_v52 }
 0x28d   : > { %628 = vrcp.f32 %v400_v53 }
 0x297   : > { %v629_v55 = vpop.eup %628 }
 0x298   : > { %v406_v56 = vrot.slane %v629_v55, %v405_v54 }
 0x29a   : > { %412 = vbcast.lane.b32.xlu1 %v406_v56, 264  ;;  %408 = vbcast.lane.b32.xlu0 %v406_v56, 256 }
 0x29e   : > { %416 = vbcast.lane.b32.xlu1 %v406_v56, 272 }
 0x2a2   : > { %420 = vbcast.lane.b32.xlu1 %v406_v56, 280 }
 0x30c   : > { %v413_v57 = vpop.permute.xlu1 %412  ;;  %v409_v58 = vpop.permute.xlu0 %408 }
 0x30d   : > { %v424_v59 = vmul.f32 %v413_v57, %v881_v5  ;;  %v425_v60 = vmul.f32 %v413_v57, %v883_v6  ;;  %v422_v61 = vmul.f32 %v409_v58, %v871_v0  ;;  %v423_v62 = vmul.f32 %v409_v58, %v873_v1 }
 0x30f   : > { %432 = vst [vmem:[%s188_s27 + $0x10] sm:$0xff] %v424_v59  ;;  %433 = vst [vmem:[%s188_s27 + $0x18] sm:$0xff] %v425_v60 }
 0x310   : > { %430 = vst [vmem:[%s188_s27] sm:$0xff] %v422_v61  ;;  %431 = vst [vmem:[%s188_s27 + $0x8] sm:$0xff] %v423_v62  ;;  %v417_v63 = vpop.permute.xlu1 %416 }
 0x311   : > { %v426_v3 = vmul.f32 %v417_v63, %v875_v2  ;;  %v427_v5 = vmul.f32 %v417_v63, %v879_v4 }
 0x313   : > { %434 = vst [vmem:[%s188_s27 + $0x20] sm:$0xff] %v426_v3  ;;  %435 = vst [vmem:[%s188_s27 + $0x28] sm:$0xff] %v427_v5 }
 0x314   : > { %v421_v0 = vpop.permute.xlu1 %420 }
 0x315   : > { %v428_v1 = vmul.f32 %v421_v0, %v887_v8  ;;  %v429_v2 = vmul.f32 %v421_v0, %v889_v9 }
 0x317   : > { %436 = vst [vmem:[%s188_s27 + $0x30] sm:$0xff] %v428_v1  ;;  %437 = vst [vmem:[%s188_s27 + $0x38] sm:$0xff] %v429_v2 }
 0x318   : > { %673 = shalt.err (!%p670_p2)
}
 0x319   : > { %s674_s7 = scalar_lea.hbm %s924_s10, 1024  ;;  %s678_s19 = scalar_lea.hbm %s973_s3, 2048 }
 0x31a   : > { %p675_p4 = scmp.ne.s32.totalorder %s924_s10, %s674_s7  ;;  %p679_p9 = scmp.lt.u32.totalorder %s924_s10, %s973_s3 }
 0x31b   : > { %p680_p1 = scmp.lt.u32.totalorder %s678_s19, %s674_s7  ;;  %p682_p6 = scmp.lt.u32.totalorder %s674_s7, %s924_s10 }
 0x31c   : > { %p676_p5 = pnand %p675_p4, %p980_p11 }
 0x31d   : > { %p681_p3 = por %p680_p1, %p679_p9 }
 0x31e   : > { %p677_p7 = pneg %p676_p5 }
 0x31f   : > { %p683_p12 = por %p682_p6, %p681_p3 }
 0x321   : > { %p684_p13 = pnand %p683_p12, %p677_p7 }
 0x323   : > { %687 = shalt.err (!%p684_p13)
}
 0x324   : > { %s735_s26 = smov 256   ;;  %s736_s27 = smov 16  }
 0x325   : > { %575 = dma.vmem_to_hbm [thread:$0]  (%p980_p11), %s919_s28, 1024, %s924_s10, %s439_s16, %s735_s26, %s735_s26, %s736_s27  }
 0x326 PF: > { %s467_s29 = sand.u32 1, %s714_s12   ;;  %p981_p8 = scmp.ne.s32.totalorder %s978_s25, 0 }
 0x327   : > { %p982_p10 = scmp.ge.s32.totalorder %s726_s15, 2  ;;  %s468_s30 = scalar_lea.sflag [#allocation4], %s467_s29 }
 0x329   : > { %p582_p0 = pnand %p982_p10, %p981_p8 }
 0x32b   : > { %709 = dma.done.wait (!%p582_p0), %s468_s30, 1024  }
 0x32c   : > { %711 = vsyncadd (!%p582_p0), %s468_s30, 4294966272  ;;  %p16_p2 = scmp.ge.s32.totalorder %s782_s18, 4   ;;  %s983_s12 = smov %s718_s13 }
 0x32d   : > { %s984_s13 = smov %s722_s14  ;;  %s985_s14 = smov %s794_s21 }
 0x32e   : > { %s986_s15 = smov %s782_s18  ;;  %18 = sbr.rel (!%p16_p2) target bundleno = 5 (0x5), region = 77 }
 0x335   :  { %473 = vsyncpa [#allocation3], 1 }
 0x336   :  { %475 = vsyncpa [#allocation3 + $0x1], 1 }
 0x337   :  { %476 = vsyncpa [#allocation4], 1 }
 0x338   :  { %478 = vsyncpa [#allocation4 + $0x1], 1 }

</bundles_post_ra>
